<compile_context>
chip_gen: v7x
topology: tpu7x:2x2x1
jax: 0.10.0
libtpu: 0.0.40
codegen_flags: <defaults>
</compile_context>

<pallas_src>
import functools

import jax
import jax.numpy as jnp
from jax import lax
from jax.experimental import pallas as pl
from jax.experimental.pallas import tpu as pltpu


def _round_up(x: int, m: int) -> int:
    return ((x + m - 1) // m) * m


def _contrastive_kernel(t1_ref, t2_ref, t2d_ref, out_ref,
                        lhs_scr, m_scr, l_scr, *,
                        tau, eps, cos_sim, n_rows, m_cols,
                        block_n, block_m, mask_cols):
    i = pl.program_id(0)           # row-tile index  ("parallel")
    j = pl.program_id(1)           # column-tile index (online-lse reduction)
    nj = pl.num_programs(1)

    # ---- LHS prep once per row tile, cached in VMEM scratch (dot dtype). ----
    @pl.when(j == 0)
    def _prep():
        t1f = t1_ref[...].astype(jnp.float32)                    # [TN, C]
        if cos_sim:
            ss = jnp.sum(t1f * t1f, axis=1, keepdims=True)
            t1f = t1f * lax.rsqrt(jnp.maximum(ss, jnp.float32(eps * eps)))
        if tau != 1.0:
            t1f = t1f * jnp.float32(1.0 / tau)                    # O(TN*C)
        lhs_scr[...] = t1f.astype(lhs_scr.dtype)
        m_scr[...] = jnp.full_like(m_scr, -1e30)
        l_scr[...] = jnp.zeros_like(l_scr)

    lhs = lhs_scr[...]             # [TN, C] normalization + 1/tau folded in
    rhs = t2_ref[...]              # [TM, C] (pre-normalized in wrapper if cos_sim)

    # logits tile 'nc,mc->nm': contract feature dim of both operands (no transpose).
    s = lax.dot_general(lhs, rhs, dimension_numbers=(((1,), (1,)), ((), ())),
                        preferred_element_type=jnp.float32)       # [TN, TM] f32

    if mask_cols:   # static: only emitted when the last column tile is partial
        col = j * block_m + lax.broadcasted_iota(jnp.int32, s.shape, 1)
        s = jnp.where(col < m_cols, s, jnp.float32(-1e30))

    # ---- online logsumexp over the column (M) grid axis. --------------------
    m_prev = m_scr[...]
    m_new = jnp.maximum(m_prev, jnp.max(s, axis=1, keepdims=True))
    l_scr[...] = (jnp.exp(m_prev - m_new) * l_scr[...]
                  + jnp.sum(jnp.exp(s - m_new), axis=1, keepdims=True))
    m_scr[...] = m_new

    # ---- finalize: per-example loss for this row tile. ----------------------
    @pl.when(j == nj - 1)
    def _finalize():
        lse = m_scr[...] + jnp.log(l_scr[...])                    # [TN, 1]
        # Diagonal (label) term <t1[r], t2[r]>/tau from the row-aligned t2 view;
        # uses the SAME cached lhs as the logits, so scalings match exactly.
        diag = jnp.sum(lhs_scr[...].astype(jnp.float32)
                       * t2d_ref[...].astype(jnp.float32),
                       axis=1, keepdims=True)                     # [TN, 1]
        per_ex = lse - diag
        row = i * block_n + lax.broadcasted_iota(jnp.int32, per_ex.shape, 0)
        out_ref[...] = jnp.where(row < n_rows, per_ex, 0.0)       # zero padded rows


def _vmem_capacity_bytes() -> int:
    try:
        return int(pltpu.get_tpu_info().vmem_capacity_bytes)
    except Exception:
        return 64 * 1024 * 1024        # conservative fallback (v7x per-TC VMEM)


def _select_tiles(N, M, cp, itemsize, sub, vmem_budget):
    tm = min(512, _round_up(M, 128))

    def fits(tn, tm_):
        inputs = 2 * (2 * tn + tm_) * cp * itemsize   # double-buffered t1/t2/t2d tiles
        scratch = tn * cp * itemsize + 4 * tn * 4     # cached LHS + m/l (+ out)
        temps = 3 * tn * tm_ * 4                      # f32 logits / exp temporaries
        return inputs + scratch + temps <= vmem_budget

    while tm > 128 and not fits(sub, tm):
        tm -= 128
    tn = min(_round_up(N, sub), 1024)                 # big row tile cuts t2 restream
    while tn > sub and not fits(tn, tm):
        tn -= sub
    return tn, tm


def contrastive_similarity(tensor_1, tensor_2, *, tau=1.0, eps=1e-6,
                           cos_sim=False, reduction="mean",
                           matmul_in_bf16=False, block_n=None, block_m=None):
    """JAX/Pallas equivalent of ContrastiveSimilarity.forward -> scalar loss."""
    N, C = tensor_1.shape
    M, C2 = tensor_2.shape
    assert C == C2, "feature dims must match"
    assert N <= M, "labels = arange(N) must index valid columns of the NxM logits"
    if reduction not in ("mean", "sum"):
        raise NotImplementedError("only 'mean'/'sum' reductions are implemented")

    # Dtype fed to the MXU (optionally bf16 for f32 inputs — flag-gated).
    work_dtype = jnp.dtype(tensor_1.dtype)
    if matmul_in_bf16 and work_dtype == jnp.dtype(jnp.float32):
        work_dtype = jnp.dtype(jnp.bfloat16)
    itemsize = work_dtype.itemsize
    sub = 16 if itemsize == 2 else 8                  # sublane packing

    # Normalize tensor_2 ONCE here (fuses with the pad below) so the kernel never
    # re-normalizes the RHS per (i, j) tile.  tensor_1 is normalized in-kernel,
    # once per row tile, and cached.
    t2 = tensor_2.astype(tensor_1.dtype)
    if cos_sim:
        t2f = t2.astype(jnp.float32)
        inv = lax.rsqrt(jnp.maximum(jnp.sum(t2f * t2f, axis=1, keepdims=True),
                                    jnp.float32(eps * eps)))
        t2 = t2f * inv

    cp = _round_up(C, 128)
    vmem_cap = _vmem_capacity_bytes()
    vmem_budget = int(vmem_cap * 0.45)                # headroom for compiler scratch
    vmem_limit = int(vmem_cap * 0.80)

    tn, tm = _select_tiles(N, M, cp, itemsize, sub, vmem_budget)
    # Small batches: force >= 2 row tiles so the "parallel" row axis actually
    # splits across v7x's two TensorCores.
    if N <= 256 and N > sub and tn >= _round_up(N, sub):
        tn = _round_up((N + 1) // 2, sub)
    if block_n is not None:
        tn = _round_up(block_n, sub)
    if block_m is not None:
        tm = _round_up(block_m, 128)

    np_ = _round_up(N, tn)
    nj = pl.cdiv(M, tm)                               # never visit all-padding tiles
    mp = max(nj * tm, np_)                            # row-pad t2 for the diag view
    ni = np_ // tn
    mask_cols = (nj * tm != M)

    t1p = jnp.pad(tensor_1.astype(work_dtype), ((0, np_ - N), (0, cp - C)))
    t2p = jnp.pad(t2.astype(work_dtype), ((0, mp - M), (0, cp - C)))

    kernel = functools.partial(
        _contrastive_kernel,
        tau=float(tau), eps=float(eps), cos_sim=bool(cos_sim),
        n_rows=N, m_cols=M, block_n=tn, block_m=tm, mask_cols=mask_cols)

    per_ex = pl.pallas_call(
        kernel,
        out_shape=jax.ShapeDtypeStruct((np_, 1), jnp.float32),
        grid_spec=pltpu.PrefetchScalarGridSpec(
            num_scalar_prefetch=0,
            grid=(ni, nj),                                     # reduction axis last
            in_specs=[
                pl.BlockSpec((tn, cp), lambda i, j: (i, 0)),   # t1 row tile
                pl.BlockSpec((tm, cp), lambda i, j: (j, 0)),   # t2 column tile
                pl.BlockSpec((tn, cp), lambda i, j: (i, 0)),   # t2 rows for diag
            ],
            out_specs=pl.BlockSpec((tn, 1), lambda i, j: (i, 0)),
            scratch_shapes=[
                pltpu.VMEM((tn, cp), work_dtype),    # cached, prepped LHS
                pltpu.VMEM((tn, 1), jnp.float32),    # running max
                pltpu.VMEM((tn, 1), jnp.float32),    # running sum
            ],
        ),
        compiler_params=pltpu.CompilerParams(
            dimension_semantics=("parallel", "arbitrary"),     # megacore on rows
            vmem_limit_bytes=vmem_limit,                       # generation-aware
        ),
    )(t1p, t2p, t2p)

    total = jnp.sum(per_ex[:, 0])             # tiny final reduction (<= np_ floats)
    return total / N if reduction == "mean" else total


def _reference(tensor_1, tensor_2, *, tau=1.0, eps=1e-6, cos_sim=False,
               reduction="mean"):
    t1 = tensor_1.astype(jnp.float32)
    t2 = tensor_2.astype(jnp.float32)
    if cos_sim:
        t1 = t1 / jnp.maximum(jnp.linalg.norm(t1, axis=1, keepdims=True), eps)
        t2 = t2 / jnp.maximum(jnp.linalg.norm(t2, axis=1, keepdims=True), eps)
    logits = jnp.einsum("nc,mc->nm", t1, t2) / tau
    labels = jnp.arange(t1.shape[0])
    logp = jax.nn.log_softmax(logits, axis=1)
    per_ex = -jnp.take_along_axis(logp, labels[:, None], axis=1)[:, 0]
    return jnp.mean(per_ex) if reduction == "mean" else jnp.sum(per_ex)


if __name__ == "__main__":
    key = jax.random.PRNGKey(0)
    k1, k2, k3, k4 = jax.random.split(key, 4)

    # --- small case matching the module's typical usage (batch=8, hidden=32) ---
    N, C = 8, 32
    t1 = jax.random.normal(k1, (N, C), dtype=jnp.float32)
    t2 = jax.random.normal(k2, (N, C), dtype=jnp.float32)

    loss = jax.block_until_ready(contrastive_similarity(t1, t2))
    ref = _reference(t1, t2)
    assert jnp.allclose(loss, ref, atol=1e-4, rtol=1e-4), (loss, ref)

    loss_cos = jax.block_until_ready(
        contrastive_similarity(t1, t2, tau=0.5, cos_sim=True, reduction="sum"))
    ref_cos = _reference(t1, t2, tau=0.5, cos_sim=True, reduction="sum")
    assert jnp.allclose(loss_cos, ref_cos, atol=1e-4, rtol=1e-4), (loss_cos, ref_cos)

    # --- rectangular case: multiple column tiles + partial-tile masking ---
    N2, M2, C2 = 300, 700, 96
    a = jax.random.normal(k3, (N2, C2), dtype=jnp.float32)
    b = jax.random.normal(k4, (M2, C2), dtype=jnp.float32)

    loss2 = jax.block_until_ready(contrastive_similarity(a, b))
    ref2 = _reference(a, b)
    assert jnp.allclose(loss2, ref2, atol=1e-3, rtol=1e-3), (loss2, ref2)

    loss2c = jax.block_until_ready(
        contrastive_similarity(a, b, tau=0.07, cos_sim=True))
    ref2c = _reference(a, b, tau=0.07, cos_sim=True)
    assert jnp.allclose(loss2c, ref2c, atol=1e-3, rtol=1e-3), (loss2c, ref2c)

    # --- explicit small tiles: multiple row tiles (LHS cache + diag per row tile) ---
    loss2b = jax.block_until_ready(
        contrastive_similarity(a, b, tau=0.2, cos_sim=True,
                               block_n=128, block_m=256))
    ref2b = _reference(a, b, tau=0.2, cos_sim=True)
    assert jnp.allclose(loss2b, ref2b, atol=1e-3, rtol=1e-3), (loss2b, ref2b)

    # --- bf16 inputs: sublane=16 packing + megacore row-tile split (N <= 256) ---
    N3, C3 = 200, 64
    c1 = jax.random.normal(k1, (N3, C3), dtype=jnp.bfloat16)
    c2 = jax.random.normal(k2, (N3, C3), dtype=jnp.bfloat16)
    loss3 = jax.block_until_ready(contrastive_similarity(c1, c2))
    ref3 = _reference(c1, c2)
    assert jnp.allclose(loss3, ref3, atol=5e-3, rtol=5e-3), (loss3, ref3)

    # --- f32 inputs with the bf16-matmul fast path (flag-gated, looser tol) ---
    loss4 = jax.block_until_ready(contrastive_similarity(a, b, matmul_in_bf16=True))
    assert jnp.allclose(loss4, ref2, atol=0.1, rtol=0.05), (loss4, ref2)

    print("KERNEL_OK")
</pallas_src>

<mosaic_0001>
module attributes {stable_mosaic.version = 11 : i64} {
  func.func @_contrastive_kernel(%arg0: i32, %arg1: i32, %arg2: memref<8x128xf32, #tpu.memory_space<vmem>>, %arg3: memref<128x128xf32, #tpu.memory_space<vmem>>, %arg4: memref<8x128xf32, #tpu.memory_space<vmem>>, %arg5: memref<8x1xf32, #tpu.memory_space<vmem>>, %arg6: memref<8x128xf32, #tpu.memory_space<vmem>>, %arg7: memref<8x1xf32, #tpu.memory_space<vmem>>, %arg8: memref<8x1xf32, #tpu.memory_space<vmem>>) attributes {dimension_semantics = [#tpu.dimension_semantics<parallel>, #tpu.dimension_semantics<arbitrary>], iteration_bounds = array<i64: 1, 1>, scalar_prefetch = 0 : i64, scratch_operands = 3 : i64, tpu.core_type = #tpu.core_type<tc>, window_params = [{transform_indices = @transform_0, window_bounds = array<i64: 8, 128>}, {transform_indices = @transform_1, window_bounds = array<i64: 128, 128>}, {transform_indices = @transform_2, window_bounds = array<i64: 8, 128>}, {transform_indices = @transform_3, window_bounds = array<i64: 8, 1>}]} {
    %c0_i32 = arith.constant 0 : i32
    %0 = arith.cmpi eq, %arg1, %c0_i32 : i32
    %1 = arith.extui %0 : i1 to i32
    %c0_i32_0 = arith.constant 0 : i32
    %2 = arith.cmpi ne, %1, %c0_i32_0 : i32
    scf.if %2 {
      %c0_17 = arith.constant 0 : index
      %c0_18 = arith.constant 0 : index
      %33 = vector.load %arg2[%c0_17, %c0_18] : memref<8x128xf32, #tpu.memory_space<vmem>>, vector<8x128xf32>
      %c0_19 = arith.constant 0 : index
      %c0_20 = arith.constant 0 : index
      %34 = vector.load %arg6[%c0_19, %c0_20] : memref<8x128xf32, #tpu.memory_space<vmem>>, vector<8x128xf32>
      tpu.vector_store %arg6[%c0_19, %c0_20], %33 {strides = array<i32>} : memref<8x128xf32, #tpu.memory_space<vmem>>, vector<8x128xf32>,
      %cst_21 = arith.constant -1.000000e+30 : f32
      %35 = vector.broadcast %cst_21 : f32 to vector<8x1xf32>
      %c0_22 = arith.constant 0 : index
      %c0_23 = arith.constant 0 : index
      %36 = vector.load %arg7[%c0_22, %c0_23] : memref<8x1xf32, #tpu.memory_space<vmem>>, vector<8x1xf32>
      tpu.vector_store %arg7[%c0_22, %c0_23], %35 {strides = array<i32>} : memref<8x1xf32, #tpu.memory_space<vmem>>, vector<8x1xf32>,
      %cst_24 = arith.constant 0.000000e+00 : f32
      %37 = vector.broadcast %cst_24 : f32 to vector<8x1xf32>
      %c0_25 = arith.constant 0 : index
      %c0_26 = arith.constant 0 : index
      %38 = vector.load %arg8[%c0_25, %c0_26] : memref<8x1xf32, #tpu.memory_space<vmem>>, vector<8x1xf32>
      tpu.vector_store %arg8[%c0_25, %c0_26], %37 {strides = array<i32>} : memref<8x1xf32, #tpu.memory_space<vmem>>, vector<8x1xf32>,
    } else {
    }
    %c0 = arith.constant 0 : index
    %c0_1 = arith.constant 0 : index
    %3 = vector.load %arg6[%c0, %c0_1] : memref<8x128xf32, #tpu.memory_space<vmem>>, vector<8x128xf32>
    %c0_2 = arith.constant 0 : index
    %c0_3 = arith.constant 0 : index
    %4 = vector.load %arg3[%c0_2, %c0_3] : memref<128x128xf32, #tpu.memory_space<vmem>>, vector<128x128xf32>
    %cst = arith.constant dense<0.000000e+00> : vector<8x128xf32>
    %5 = tpu.matmul %3, %4, %cst {dimension_numbers = #tpu.dot_dimension_numbers<[1], [1], [0], [0], [0, 0, 1, 0], [], []>} : vector<8x128xf32>, vector<128x128xf32>, vector<8x128xf32> -> vector<8x128xf32>
    %c128_i32 = arith.constant 128 : i32
    %6 = arith.muli %arg1, %c128_i32 : i32
    %7 = tpu.iota {dimensions = array<i32: 1>} : vector<8x128xi32>
    %8 = vector.broadcast %6 : i32 to vector<8x128xi32>
    %9 = arith.addi %8, %7 : vector<8x128xi32>
    %c8_i32 = arith.constant 8 : i32
    %10 = vector.broadcast %c8_i32 : i32 to vector<8x128xi32>
    %11 = arith.cmpi slt, %9, %10 : vector<8x128xi32>
    %cst_4 = arith.constant -1.000000e+30 : f32
    %12 = vector.broadcast %cst_4 : f32 to vector<8x128xf32>
    %13 = arith.select %11, %5, %12 : vector<8x128xi1>, vector<8x128xf32>
    %c0_5 = arith.constant 0 : index
    %c0_6 = arith.constant 0 : index
    %14 = vector.load %arg7[%c0_5, %c0_6] : memref<8x1xf32, #tpu.memory_space<vmem>>, vector<8x1xf32>
    %cst_7 = arith.constant dense<0xFF800000> : vector<8xf32>
    %15 = vector.multi_reduction <maximumf>, %13, %cst_7 [1] : vector<8x128xf32> to vector<8xf32>
    %16 = vector.shape_cast %15 : vector<8xf32> to vector<8x1xf32>
    %17 = arith.maximumf %14, %16 : vector<8x1xf32>
    %18 = arith.subf %14, %17 : vector<8x1xf32>
    %19 = math.exp %18 : vector<8x1xf32>
    %c0_8 = arith.constant 0 : index
    %c0_9 = arith.constant 0 : index
    %20 = vector.load %arg8[%c0_8, %c0_9] : memref<8x1xf32, #tpu.memory_space<vmem>>, vector<8x1xf32>
    %21 = arith.mulf %19, %20 : vector<8x1xf32>
    %22 = vector.broadcast %17 : vector<8x1xf32> to vector<8x128xf32>
    %23 = arith.subf %13, %22 : vector<8x128xf32>
    %24 = math.exp %23 : vector<8x128xf32>
    %cst_10 = arith.constant dense<0.000000e+00> : vector<8xf32>
    %25 = vector.multi_reduction <add>, %24, %cst_10 [1] : vector<8x128xf32> to vector<8xf32>
    %26 = vector.shape_cast %25 : vector<8xf32> to vector<8x1xf32>
    %27 = arith.addf %21, %26 : vector<8x1xf32>
    %c0_11 = arith.constant 0 : index
    %c0_12 = arith.constant 0 : index
    %28 = vector.load %arg8[%c0_11, %c0_12] : memref<8x1xf32, #tpu.memory_space<vmem>>, vector<8x1xf32>
    tpu.vector_store %arg8[%c0_11, %c0_12], %27 {strides = array<i32>} : memref<8x1xf32, #tpu.memory_space<vmem>>, vector<8x1xf32>,
    %c0_13 = arith.constant 0 : index
    %c0_14 = arith.constant 0 : index
    %29 = vector.load %arg7[%c0_13, %c0_14] : memref<8x1xf32, #tpu.memory_space<vmem>>, vector<8x1xf32>
    tpu.vector_store %arg7[%c0_13, %c0_14], %17 {strides = array<i32>} : memref<8x1xf32, #tpu.memory_space<vmem>>, vector<8x1xf32>,
    %c0_i32_15 = arith.constant 0 : i32
    %30 = arith.cmpi eq, %arg1, %c0_i32_15 : i32
    %31 = arith.extui %30 : i1 to i32
    %c0_i32_16 = arith.constant 0 : i32
    %32 = arith.cmpi ne, %31, %c0_i32_16 : i32
    scf.if %32 {
      %c0_17 = arith.constant 0 : index
      %c0_18 = arith.constant 0 : index
      %33 = vector.load %arg7[%c0_17, %c0_18] : memref<8x1xf32, #tpu.memory_space<vmem>>, vector<8x1xf32>
      %c0_19 = arith.constant 0 : index
      %c0_20 = arith.constant 0 : index
      %34 = vector.load %arg8[%c0_19, %c0_20] : memref<8x1xf32, #tpu.memory_space<vmem>>, vector<8x1xf32>
      %35 = math.log %34 : vector<8x1xf32>
      %36 = arith.addf %33, %35 : vector<8x1xf32>
      %c0_21 = arith.constant 0 : index
      %c0_22 = arith.constant 0 : index
      %37 = vector.load %arg6[%c0_21, %c0_22] : memref<8x128xf32, #tpu.memory_space<vmem>>, vector<8x128xf32>
      %c0_23 = arith.constant 0 : index
      %c0_24 = arith.constant 0 : index
      %38 = vector.load %arg4[%c0_23, %c0_24] : memref<8x128xf32, #tpu.memory_space<vmem>>, vector<8x128xf32>
      %39 = arith.mulf %37, %38 : vector<8x128xf32>
      %cst_25 = arith.constant dense<0.000000e+00> : vector<8xf32>
      %40 = vector.multi_reduction <add>, %39, %cst_25 [1] : vector<8x128xf32> to vector<8xf32>
      %41 = vector.shape_cast %40 : vector<8xf32> to vector<8x1xf32>
      %42 = arith.subf %36, %41 : vector<8x1xf32>
      %c8_i32_26 = arith.constant 8 : i32
      %43 = arith.muli %arg0, %c8_i32_26 : i32
      %44 = tpu.iota {dimensions = array<i32: 0>} : vector<8x1xi32>
      %45 = vector.broadcast %43 : i32 to vector<8x1xi32>
      %46 = arith.addi %45, %44 : vector<8x1xi32>
      %c8_i32_27 = arith.constant 8 : i32
      %47 = vector.broadcast %c8_i32_27 : i32 to vector<8x1xi32>
      %48 = arith.cmpi slt, %46, %47 : vector<8x1xi32>
      %cst_28 = arith.constant 0.000000e+00 : f32
      %49 = vector.broadcast %cst_28 : f32 to vector<8x1xf32>
      %50 = arith.select %48, %42, %49 : vector<8x1xi1>, vector<8x1xf32>
      %c0_29 = arith.constant 0 : index
      %c0_30 = arith.constant 0 : index
      %51 = vector.load %arg5[%c0_29, %c0_30] : memref<8x1xf32, #tpu.memory_space<vmem>>, vector<8x1xf32>
      tpu.vector_store %arg5[%c0_29, %c0_30], %50 {strides = array<i32>} : memref<8x1xf32, #tpu.memory_space<vmem>>, vector<8x1xf32>,
    } else {
    }
    return
  }
  func.func @transform_0(%arg0: i32, %arg1: i32) -> (i32, i32) {
    %c0_i32 = arith.constant 0 : i32
    %c0_i32_0 = arith.constant 0 : i32
    return %arg0, %c0_i32 : i32, i32
  }
  func.func @transform_1(%arg0: i32, %arg1: i32) -> (i32, i32) {
    %c0_i32 = arith.constant 0 : i32
    %c0_i32_0 = arith.constant 0 : i32
    return %arg1, %c0_i32 : i32, i32
  }
  func.func @transform_2(%arg0: i32, %arg1: i32) -> (i32, i32) {
    %c0_i32 = arith.constant 0 : i32
    %c0_i32_0 = arith.constant 0 : i32
    return %arg0, %c0_i32 : i32, i32
  }
  func.func @transform_3(%arg0: i32, %arg1: i32) -> (i32, i32) {
    %c0_i32 = arith.constant 0 : i32
    %c0_i32_0 = arith.constant 0 : i32
    return %arg0, %c0_i32 : i32, i32
  }
}

</mosaic_0001>

<bundles_post_ra>
// kernel: tpu_custom_call.1
= control target key start
LH: loop header
LB: loop body
LE: loop exit
PB: predicated region body
PF: predicated region fallthrough
CT: control target
= control target key end

     0   :  { %8 = vsyncpa [#allocation6], 0  ;;  %s445_s0 = inlined_call_operand.hbm [shape: f32[8,128], index: 0, kind: input, shape index: {}]   ;;  %s446_s1 = inlined_call_operand.hbm [shape: f32[128,128], index: 1, kind: input, shape index: {}]   ;;  %s447_s2 = inlined_call_operand.hbm [shape: f32[128,128], index: 2, kind: input, shape index: {}]   ;;  %s448_s3 = inlined_call_operand.vmem [shape: f32[8,1], index: 3, kind: output, shape index: {}]  }
   0x1   :  { %9 = vsyncpa [#allocation8], 0  ;;  %s368_s12 = smov [#allocation7]   ;;  %s298_s16 = scalar_lea.hbm %s446_s1, 2048 }
   0x2   :  { %s25_s13 = sshll.u32 %s368_s12, 4  ;;  %p299_p0 = scmp.ne.s32.totalorder %s446_s1, %s298_s16  ;;  %s26_s13 = int_to_ptr.vmem [resolvable:$true] %s25_s13 }
   0x3   :  { %p302_p1 = scmp.lt.u32.totalorder %s298_s16, %s446_s1 }
   0x5   :  { %p304_p2 = pnand %p302_p1, %p299_p0 }
   0x7   :  { %307 = shalt.err (!%p304_p2)
}
   0x8   :  { %s308_s21 = scalar_lea.vmem %s26_s13, 2048  ;;  %p313_p4 = scmp.lt.s32.totalorder %s26_s13, %s26_s13 }
   0x9   :  { %p309_p3 = scmp.ne.s32.totalorder %s26_s13, %s308_s21  ;;  %p314_p5 = scmp.lt.s32.totalorder %s308_s21, %s308_s21 }
   0xb   :  { %p315_p6 = por %p314_p5, %p313_p4 }
   0xd   :  { %p316_p7 = pnand %p315_p6, %p309_p3 }
   0xf   :  { %319 = shalt.err (!%p316_p7)
}
  0x10   :  { %s369_s22 = smov 128   ;;  %s370_s23 = smov 8  }
  0x11   :  { %31 = dma.hbm_to_vmem [thread:$0]  %s446_s1, 2048, %s26_s13, [#allocation8], %s369_s22, %s369_s22, %s370_s23  }
  0x12   :  { %s371_s26 = smov [#allocation5]   ;;  %s372_s28 = smov [#allocation9]  }
  0x13   :  { %s16_s27 = sshll.u32 %s371_s26, 4  ;;  %s38_s29 = sshll.u32 %s372_s28, 4  ;;  %s17_s27 = int_to_ptr.vmem [resolvable:$true] %s16_s27  ;;  %s39_s29 = int_to_ptr.vmem [resolvable:$true] %s38_s29 }
  0x14   :  { %s320_s5 = scalar_lea.hbm %s445_s0, 128 }
  0x15   :  { %p321_p8 = scmp.ne.s32.totalorder %s445_s0, %s320_s5  ;;  %p324_p9 = scmp.lt.u32.totalorder %s320_s5, %s445_s0 }
  0x17   :  { %p326_p10 = pnand %p324_p9, %p321_p8 }
  0x19   :  { %329 = shalt.err (!%p326_p10)
}
  0x1a   :  { %s330_s1 = scalar_lea.vmem %s17_s27, 128  ;;  %p335_p12 = scmp.lt.s32.totalorder %s17_s27, %s17_s27 }
  0x1b   :  { %p331_p11 = scmp.ne.s32.totalorder %s17_s27, %s330_s1  ;;  %p336_p13 = scmp.lt.s32.totalorder %s330_s1, %s330_s1 }
  0x1d   :  { %p337_p0 = por %p336_p13, %p335_p12 }
  0x1f   :  { %p338_p1 = pnand %p337_p0, %p331_p11 }
  0x21   :  { %341 = shalt.err (!%p338_p1)
}
  0x22   :  { %19 = dma.hbm_to_vmem [thread:$0]  %s445_s0, 128, %s17_s27, [#allocation6]  }
  0x23   :  { %s342_s14 = scalar_lea.hbm %s447_s2, 128  ;;  %s344_s19 = scalar_lea.hbm %s447_s2, 2048 }
  0x24   :  { %p343_p2 = scmp.ne.s32.totalorder %s447_s2, %s342_s14  ;;  %p345_p3 = scmp.lt.u32.totalorder %s344_s19, %s342_s14 }
  0x25   :  { %p346_p4 = scmp.lt.u32.totalorder %s342_s14, %s447_s2 }
  0x27   :  { %p347_p5 = por %p346_p4, %p345_p3 }
  0x29   :  { %p348_p6 = pnand %p347_p5, %p343_p2 }
  0x2b   :  { %351 = shalt.err (!%p348_p6)
}
  0x2c   :  { %s352_s0 = scalar_lea.vmem %s39_s29, 128  ;;  %p357_p8 = scmp.lt.s32.totalorder %s39_s29, %s39_s29 }
  0x2d   :  { %p353_p7 = scmp.ne.s32.totalorder %s39_s29, %s352_s0  ;;  %p358_p9 = scmp.lt.s32.totalorder %s352_s0, %s352_s0 }
  0x2f   :  { %p359_p10 = por %p358_p9, %p357_p8 }
  0x31   :  { %p360_p11 = pnand %p359_p10, %p353_p7 }
  0x33   :  { %363 = shalt.err (!%p360_p11)
}
  0x34   :  { %41 = dma.hbm_to_vmem [thread:$0]  %s447_s2, 128, %s39_s29, [#allocation8]  }
  0x35   :  { %364 = dma.done.wait [#allocation6], 128  }
  0x36   :  { %365 = vsyncadd [#allocation6], 4294967168 }
  0x37   :  { %366 = dma.done.wait [#allocation8], 2176  }
  0x38   :  { %367 = vsyncadd [#allocation8], 4294965120  ;;  %vm57_vm0 = vcmask 7168   ;;  %v373_v0 = vmov 0.0|0.0   ;;  %v374_v1 = vmov 0.0   ;;  %vm375_vm1 = vmmov 0  }
  0x39   :  { %257 = vmatprep.subr.bf16.mxu0 %v373_v0  ;;  %59 = vst.msk [vmem:[#allocation4] sm:$0xff] %vm57_vm0, %v374_v1  ;;  %254 = vmatprep.mubr.msk.f32.mxu0 %vm375_vm1, %v374_v1  ;;  %v61_v2 = vld [vmem:[#allocation7] sm:$0xff]  ;;  %v62_v3 = vld [vmem:[#allocation7 + $0x8] sm:$0xff]  ;;  %v63_v5 = vld [vmem:[#allocation7 + $0x10] sm:$0xff]  ;;  %v376_v27 = vmov -1e+30   ;;  %v148_v28 = vlaneseq }
  0x3a   :  { %v258_v4 = vpack.c.bf16 %v62_v3, %v61_v2  ;;  %v64_v6 = vld [vmem:[#allocation7 + $0x18] sm:$0xff]  ;;  %v65_v8 = vld [vmem:[#allocation7 + $0x20] sm:$0xff]  ;;  %v66_v9 = vld [vmem:[#allocation7 + $0x28] sm:$0xff]  ;;  %58 = vst.msk [vmem:[#allocation3] sm:$0xff] %vm57_vm0, %v376_v27  ;;  %v377_v33 = vmov 0  }
  0x3b   :  { %v261_v7 = vpack.c.bf16 %v64_v6, %v63_v5  ;;  %v264_v10 = vpack.c.bf16 %v66_v9, %v65_v8  ;;  %v67_v11 = vld [vmem:[#allocation7 + $0x30] sm:$0xff]  ;;  %v68_v12 = vld [vmem:[#allocation7 + $0x38] sm:$0xff]  ;;  %v69_v14 = vld [vmem:[#allocation7 + $0x40] sm:$0xff]  ;;  %v149_v29 = vand.u32 127, %v148_v28  ;;  %291 = vset.pattern.permute.xlu0 %v377_v33 }
  0x3c   :  { %259 = vmatpush3.bf16.xpose.msra.mxu0 %v258_v4  ;;  %v267_v13 = vpack.c.bf16 %v68_v12, %v67_v11  ;;  %v70_v15 = vld [vmem:[#allocation7 + $0x48] sm:$0xff]  ;;  %v71_v17 = vld [vmem:[#allocation7 + $0x50] sm:$0xff]  ;;  %v72_v18 = vld [vmem:[#allocation7 + $0x58] sm:$0xff] }
  0x3d   :  { %260 = vmatprep.subr.bf16.mxu0 %v373_v0  ;;  %v270_v16 = vpack.c.bf16 %v70_v15, %v69_v14  ;;  %v273_v19 = vpack.c.bf16 %v72_v18, %v71_v17  ;;  %v73_v20 = vld [vmem:[#allocation7 + $0x60] sm:$0xff]  ;;  %v74_v21 = vld [vmem:[#allocation7 + $0x68] sm:$0xff]  ;;  %v75_v23 = vld [vmem:[#allocation7 + $0x70] sm:$0xff]  ;;  %vm152_vm2 = vcmp.lt.s32.totalorder %v149_v29, 8 }
  0x3e   :  { %v276_v22 = vpack.c.bf16 %v74_v21, %v73_v20  ;;  %v76_v24 = vld [vmem:[#allocation7 + $0x78] sm:$0xff]  ;;  %v186_v41 = vld [vmem:[#allocation9] sm:$0xff] }
  0x3f   :  { %v279_v25 = vpack.c.bf16 %v76_v24, %v75_v23  ;;  %v55_v26 = vld [vmem:[#allocation5] sm:$0xff] }
  0x40   :  { %v187_v43 = vmul.f32 %v186_v41, %v55_v26  ;;  %v161_v46 = vld [vmem:[#allocation4] sm:$0xff] }
  0x41   :  { %v154_v34 = vld [vmem:[#allocation3] sm:$0xff] }
  0x44   :  { %262 = vmatpush3.bf16.xpose.msra.mxu0 %v261_v7 }
  0x45   :  { %263 = vmatprep.subr.bf16.mxu0 %v373_v0 }
  0x4c   :  { %265 = vmatpush3.bf16.xpose.msra.mxu0 %v264_v10 }
  0x4d   :  { %266 = vmatprep.subr.bf16.mxu0 %v373_v0 }
  0x54   :  { %268 = vmatpush3.bf16.xpose.msra.mxu0 %v267_v13 }
  0x55   :  { %269 = vmatprep.subr.bf16.mxu0 %v373_v0 }
  0x5c   :  { %271 = vmatpush3.bf16.xpose.msra.mxu0 %v270_v16 }
  0x5d   :  { %272 = vmatprep.subr.bf16.mxu0 %v373_v0 }
  0x64   :  { %274 = vmatpush3.bf16.xpose.msra.mxu0 %v273_v19 }
  0x65   :  { %275 = vmatprep.subr.bf16.mxu0 %v373_v0 }
  0x6c   :  { %277 = vmatpush3.bf16.xpose.msra.mxu0 %v276_v22 }
  0x6d   :  { %278 = vmatprep.subr.bf16.mxu0 %v373_v0 }
  0x74   :  { %280 = vmatpush3.bf16.xpose.msra.mxu0 %v279_v25 }
  0x7b   :  { %255 = vmatmul.mubr.f32.vlgmr.msra.gmra.mrb[0].mxu0 %v55_v26 }
 0x14e   :  { %v143_v30 = vpop.f32.mrb[0].mxu0 }
 0x14f   :  { %v256_v31 = vpop.f32.mrb[1].mxu0  ;;  %v153_v32 = vsel %vm152_vm2, %v143_v30, -1e+30 }
 0x150   :  { %155 = vmax.xlane.f32.xlu0 %v153_v32 }
 0x1dd   :  { %v156_v35 = vpop.xlane.xlu0 %155 }
 0x1de   :  { %v157_v36 = vmax.f32 %v154_v34, %v156_v35 }
 0x1e0   :  { %v158_v37 = vsub.f32 %v154_v34, %v157_v36  ;;  %176 = vst.msk [vmem:[#allocation3] sm:$0xff] %vm57_vm0, %v157_v36  ;;  %165 = vperm.xlu0 %291, %v157_v36  }
 0x1e2   :  { %v159_v44 = vmul.f32 1.442695, %v158_v37 }
 0x1e7   :  { %v180_v54 = vld [vmem:[#allocation3] sm:$0xff] }
 0x25f   :  { %v166_v38 = vpop.permute.xlu0 %165 }
 0x260   :  { %v168_v39 = vsub.f32 %v153_v32, %v166_v38 }
 0x262   :  { %v169_v40 = vmul.f32 1.442695, %v168_v39 }
 0x264   :  { %292 = vpow2.f32 %v169_v40 }
 0x265   :  { %294 = vpow2.f32 %v159_v44 }
 0x26e   :  { %v293_v42 = vpop.eup %292 }
 0x26f   :  { %171 = vadd.xlane.f32.xlu1 %v293_v42  ;;  %v295_v45 = vpop.eup %294 }
 0x270   :  { %v162_v47 = vmul.f32 %v295_v45, %v161_v46 }
 0x273   :  { %188 = vadd.xlane.f32.xlu1 %v187_v43 }
 0x2fc   :  { %v172_v48 = vpop.xlane.xlu1 %171 }
 0x2fd   :  { %v173_v49 = vadd.f32 %v172_v48, %v162_v47 }
 0x2ff   :  { %175 = vst.msk [vmem:[#allocation4] sm:$0xff] %vm57_vm0, %v173_v49 }
 0x300   :  { %v189_v53 = vpop.xlane.xlu1 %188 }
 0x306   :  { %v181_v50 = vld [vmem:[#allocation4] sm:$0xff] }
 0x307   :  { %296 = vlog2.f32 %v181_v50 }
 0x311   :  { %v297_v51 = vpop.eup %296 }
 0x312   :  { %v183_v52 = vmul.f32 0.6931472, %v297_v51 }
 0x314   :  { %v184_v55 = vadd.f32 %v183_v52, %v180_v54 }
 0x316   :  { %v190_v56 = vsub.f32 %v184_v55, %v189_v53 }
 0x318   :  { %198 = vst.msk [vmem:[%s448_s3] sm:$0xff] %vm57_vm0, %v190_v56 }
 0x319   :  { %203 = vsyncpa [#allocation6], 1 }
 0x31a   :  { %204 = vsyncpa [#allocation8], 1 }

</bundles_post_ra>
